<compile_context>
chip_gen: v7x
topology: tpu7x:2x2x1
jax: 0.10.0
libtpu: 0.0.40
codegen_flags: <defaults>
</compile_context>

<pallas_src>
import math
from functools import partial

import jax
import jax.numpy as jnp
from jax.experimental import pallas as pl
from jax.experimental.pallas import tpu as pltpu


def _round_up(v, m):
    return ((v + m - 1) // m) * m


def _gru_cell_kernel(x_ref, h_ref, wx_ref, wh_ref, b_ref, hy_ref, *, tn):
    """One (batch-tile, hidden-tile) step.

    x_ref : (bb, in)       input tile
    h_ref : (bb, H_p)      full (padded) hidden state for this batch tile
    wx_ref: (in, 2*tn)     [z | g] input->hidden columns for this hidden tile
    wh_ref: (H_p, 2*tn)    [z | g] hidden->hidden columns for this hidden tile
    b_ref : (1, 2*tn)      folded [z | g] bias for this hidden tile (f32)
    hy_ref: (bb, tn)       output slice for this hidden tile
    """
    x = x_ref[...]
    h = h_ref[...]

    # Fused [z | g] pre-activations, f32 accumulation on the MXU.
    pre = (jnp.dot(x, wx_ref[...], preferred_element_type=jnp.float32)
           + jnp.dot(h, wh_ref[...], preferred_element_type=jnp.float32)
           + b_ref[...])

    z = jax.nn.sigmoid(pre[:, :tn])
    g = jnp.tanh(pre[:, tn:])

    if tn == h_ref.shape[-1]:
        # single hidden tile: blend against the full hidden state
        h_blk = h
    else:
        # streamed hidden tiles: take this tile's 128-aligned column slice
        col0 = pl.multiple_of(pl.program_id(0) * tn, 128)
        h_blk = h_ref[:, pl.ds(col0, tn)]

    # hy = z*h + (1-z)*g, written with one fewer VPU op / live temp.
    hy = g + z * (h_blk.astype(jnp.float32) - g)
    hy_ref[...] = hy.astype(hy_ref.dtype)


def pack_gru_params(params, weight_dtype=None,
                    max_resident_bytes=24 << 20, max_stream_block_bytes=12 << 20):
    """One-time host-side packing.

    - Drops the dead reset-gate (R*) params: the torch forward computes ry but
      never uses it, so hy is unchanged. (Note: this matches the given module,
      NOT standard nn.GRUCell semantics.)
    - Transposes and zero-pads the hidden axis to a multiple of 128.
    - Fuses Z/G weights column-wise and folds paired biases.
    - If the packed weights are too large to sit resident in VMEM, repacks them
      as (n_tiles, K, 2*tn) hidden-column tiles for streaming.
    - Optionally stores weights in a narrower dtype (e.g. bf16); biases stay f32.
    """
    hidden, input_size = params["Zx2h_w"].shape
    H_p = _round_up(hidden, 128)
    w_dt = jnp.dtype(weight_dtype) if weight_dtype is not None else params["Zx2h_w"].dtype
    itemsize = jnp.dtype(w_dt).itemsize

    def padded_t(w, rows):
        wt = jnp.transpose(w)                                   # (K, hidden)
        return jnp.pad(wt, ((0, rows - wt.shape[0]), (0, H_p - wt.shape[1])))

    wzx = padded_t(params["Zx2h_w"], input_size)                # (in,  H_p)
    wgx = padded_t(params["Gx2h_w"], input_size)
    wzh = padded_t(params["Zh2h_w"], H_p)                       # (H_p, H_p)
    wgh = padded_t(params["Gh2h_w"], H_p)
    bz = jnp.pad(params["Zx2h_b"] + params["Zh2h_b"], (0, H_p - hidden)).astype(jnp.float32)
    bg = jnp.pad(params["Gx2h_b"] + params["Gh2h_b"], (0, H_p - hidden)).astype(jnp.float32)

    weight_bytes = (input_size * 2 * H_p + H_p * 2 * H_p) * itemsize

    # Choose the hidden-column tile width tn (multiple of 128 dividing H_p).
    if weight_bytes <= max_resident_bytes or H_p == 128:
        tn, n_tiles = H_p, 1
    else:
        d = H_p // 128
        t_best = 1
        for t in range(1, d + 1):
            if d % t:
                continue
            tn_c = t * 128
            blk = (input_size + H_p + 1) * 2 * tn_c * itemsize
            if tn_c <= 512 and blk <= max_stream_block_bytes:
                t_best = t
        tn, n_tiles = t_best * 128, d // t_best

    if n_tiles == 1:
        # Resident layout: 2-D [z | g].
        w_x = jnp.concatenate([wzx, wgx], axis=1).astype(w_dt)          # (in,  2*H_p)
        w_h = jnp.concatenate([wzh, wgh], axis=1).astype(w_dt)          # (H_p, 2*H_p)
        b = jnp.concatenate([bz, bg]).reshape(1, 2 * H_p)
    else:
        # Streaming layout: (n_tiles, K, 2*tn) with z/g of each tile adjacent.
        def tile_cat(a_z, a_g):
            k = a_z.shape[0]
            az = a_z.reshape(k, n_tiles, tn).transpose(1, 0, 2)
            ag = a_g.reshape(k, n_tiles, tn).transpose(1, 0, 2)
            return jnp.concatenate([az, ag], axis=-1)                   # (n_tiles, K, 2*tn)

        w_x = tile_cat(wzx, wgx).astype(w_dt)
        w_h = tile_cat(wzh, wgh).astype(w_dt)
        b = jnp.concatenate([bz.reshape(n_tiles, 1, tn),
                             bg.reshape(n_tiles, 1, tn)], axis=-1)
    return {"w_x": w_x, "w_h": w_h, "b": b}


def gru_cell_forward(x, packed, hx=None, *, hidden_size=None):
    """x: (B, input_size). packed: output of pack_gru_params. hx: (B, H) or None.

    hidden_size is needed (static) only when hx is None; otherwise it is taken
    from hx.shape[1].
    """
    batch, input_size = x.shape
    wx, wh, b = packed["w_x"], packed["w_h"], packed["b"]
    resident = wx.ndim == 2
    if resident:
        H_p = wh.shape[0]
        tn, n_tiles = wh.shape[1] // 2, 1
    else:
        n_tiles, H_p = wx.shape[0], wh.shape[1]
        tn = wx.shape[2] // 2

    if hx is not None:
        hidden = hx.shape[1] if hidden_size is None else hidden_size
    else:
        if hidden_size is None:
            raise ValueError("hidden_size must be provided when hx is None")
        hidden = hidden_size

    if hx is None:
        h_p = jnp.zeros((batch, H_p), dtype=x.dtype)
    elif hx.shape[1] != H_p:
        h_p = jnp.pad(hx, ((0, 0), (0, H_p - hx.shape[1])))
    else:
        h_p = hx

    # Batch tile: whole batch, or the largest sublane-packed divisor up to 256.
    # Floor depends on dtype packing (8 rows f32, 16 bf16, 32 int8/fp8).
    row_unit = {4: 8, 2: 16, 1: 32}.get(jnp.dtype(x.dtype).itemsize, 8)
    bb = batch
    if batch >= 2 * row_unit and batch % row_unit == 0:
        bb = row_unit
        while bb * 2 <= min(batch, 256) and batch % (bb * 2) == 0:
            bb *= 2
    n_batch = batch // bb

    grid = (n_tiles, n_batch)

    if resident:
        # Whole weights live in VMEM once (single copy, no double-buffering).
        w_specs = [pl.BlockSpec(memory_space=pltpu.MemorySpace.VMEM)] * 3
        w_vmem_bytes = sum(int(a.size) * a.dtype.itemsize for a in (wx, wh, b))
    else:
        # Stream hidden-column tiles; the leading (tile) dim is squeezed away.
        w_specs = [
            pl.BlockSpec((None, wx.shape[1], 2 * tn), lambda j, i: (j, 0, 0)),
            pl.BlockSpec((None, H_p, 2 * tn), lambda j, i: (j, 0, 0)),
            pl.BlockSpec((None, 1, 2 * tn), lambda j, i: (j, 0, 0)),
        ]
        w_vmem_bytes = 2 * (wx.shape[1] + H_p + 1) * 2 * tn * wx.dtype.itemsize

    act_vmem_bytes = 2 * bb * (input_size * x.dtype.itemsize
                               + H_p * h_p.dtype.itemsize
                               + tn * x.dtype.itemsize)
    vmem_limit = int(min(max(1.25 * (w_vmem_bytes + act_vmem_bytes) + (2 << 20),
                             32 << 20), 48 << 20))

    kernel = partial(_gru_cell_kernel, tn=tn)
    hy_p = pl.pallas_call(
        kernel,
        out_shape=jax.ShapeDtypeStruct((batch, H_p), x.dtype),
        grid=grid,
        in_specs=[
            pl.BlockSpec((bb, input_size), lambda j, i: (i, 0)),   # x batch tile
            pl.BlockSpec((bb, H_p), lambda j, i: (i, 0)),          # h batch tile
            *w_specs,                                              # wx, wh, bias
        ],
        out_specs=pl.BlockSpec((bb, tn), lambda j, i: (i, j)),     # lane-dense hy tile
        compiler_params=pltpu.CompilerParams(
            dimension_semantics=("parallel", "parallel"),
            vmem_limit_bytes=vmem_limit),
    )(x, h_p, wx, wh, b)

    return hy_p if hidden == H_p else hy_p[:, :hidden]


def init_gru_params(key, input_size, hidden_size, dtype=jnp.float32):
    """Matches torch reset_parameters(): uniform(-std, std), std = 1/sqrt(hidden)."""
    std = 1.0 / math.sqrt(hidden_size)
    names_and_shapes = []
    for name in ("Zx2h", "Rx2h", "Gx2h"):
        names_and_shapes.append((name + "_w", (hidden_size, input_size)))
        names_and_shapes.append((name + "_b", (hidden_size,)))
    for name in ("Zh2h", "Rh2h", "Gh2h"):
        names_and_shapes.append((name + "_w", (hidden_size, hidden_size)))
        names_and_shapes.append((name + "_b", (hidden_size,)))
    keys = jax.random.split(key, len(names_and_shapes))
    params = {}
    for (name, shape), k in zip(names_and_shapes, keys):
        params[name] = jax.random.uniform(k, shape, dtype=dtype, minval=-std, maxval=std)
    return params


def gru_cell_reference(x, params, hx=None):
    """Pure-JAX reference mirroring the torch forward exactly (including dead ry)."""
    batch = x.shape[0]
    hidden = params["Zh2h_w"].shape[0]
    if hx is None:
        hx = jnp.zeros((batch, hidden), dtype=x.dtype)

    def lin(a, name):
        return a @ params[name + "_w"].T + params[name + "_b"]

    zy = jax.nn.sigmoid(lin(x, "Zx2h") + lin(hx, "Zh2h"))
    ry = jax.nn.sigmoid(lin(x, "Rx2h") + lin(hx, "Rh2h"))  # unused, as in torch code
    del ry
    gy = jnp.tanh(lin(x, "Gx2h") + lin(hx, "Gh2h"))
    return zy * hx + (1 - zy) * gy


if __name__ == "__main__":
    input_size = 16
    hidden_size = 32
    batch = 2

    key = jax.random.PRNGKey(0)
    k_param, k_x, k_h = jax.random.split(key, 3)

    params = init_gru_params(k_param, input_size, hidden_size)
    packed = pack_gru_params(params)  # one-time host-side packing, out of the call path
    x = jax.random.normal(k_x, (batch, input_size), dtype=jnp.float32)
    hx = jax.random.normal(k_h, (batch, hidden_size), dtype=jnp.float32)

    fwd = jax.jit(gru_cell_forward, static_argnames=("hidden_size",))

    # Explicit hidden state and hx=None (zeros), like the module allows.
    hy = jax.block_until_ready(fwd(x, packed, hx))
    hy_none = jax.block_until_ready(fwd(x, packed, None, hidden_size=hidden_size))

    ref = gru_cell_reference(x, params, hx)
    ref_none = gru_cell_reference(x, params, None)

    assert hy.shape == (batch, hidden_size)
    assert jnp.allclose(hy, ref, atol=1e-5, rtol=1e-5)
    assert jnp.allclose(hy_none, ref_none, atol=1e-5, rtol=1e-5)

    # bf16 weight-only variant (halves weight HBM bytes / VMEM; f32 accumulation
    # is preserved by preferred_element_type) — looser tolerance by construction.
    packed_bf16 = pack_gru_params(params, weight_dtype=jnp.bfloat16)
    hy_bf16 = jax.block_until_ready(
        fwd(x.astype(jnp.bfloat16), packed_bf16, hx.astype(jnp.bfloat16)))
    assert hy_bf16.shape == (batch, hidden_size)
    assert jnp.allclose(hy_bf16.astype(jnp.float32), ref, atol=1e-1, rtol=1e-1)

    print("KERNEL_OK")
</pallas_src>

<mosaic_0001>
module attributes {stable_mosaic.version = 11 : i64} {
  func.func @_gru_cell_kernel(%arg0: i32, %arg1: i32, %arg2: memref<2x16xf32, #tpu.memory_space<vmem>>, %arg3: memref<2x128xf32, #tpu.memory_space<vmem>>, %arg4: memref<16x256xf32, #tpu.memory_space<vmem>>, %arg5: memref<128x256xf32, #tpu.memory_space<vmem>>, %arg6: memref<1x256xf32, #tpu.memory_space<vmem>>, %arg7: memref<2x128xf32, #tpu.memory_space<vmem>>) attributes {dimension_semantics = [#tpu.dimension_semantics<parallel>, #tpu.dimension_semantics<parallel>], iteration_bounds = array<i64: 1, 1>, scalar_prefetch = 0 : i64, scratch_operands = 0 : i64, tpu.core_type = #tpu.core_type<tc>, window_params = [{transform_indices = @transform_0, window_bounds = array<i64: 2, 16>}, {transform_indices = @transform_1, window_bounds = array<i64: 2, 128>}, {pipeline_mode = #tpu.pipeline_mode<synchronous>, transform_indices = @transform_2, window_bounds = array<i64: 16, 256>}, {pipeline_mode = #tpu.pipeline_mode<synchronous>, transform_indices = @transform_3, window_bounds = array<i64: 128, 256>}, {pipeline_mode = #tpu.pipeline_mode<synchronous>, transform_indices = @transform_4, window_bounds = array<i64: 1, 256>}, {transform_indices = @transform_5, window_bounds = array<i64: 2, 128>}]} {
    %c0 = arith.constant 0 : index
    %c0_0 = arith.constant 0 : index
    %0 = vector.load %arg2[%c0, %c0_0] : memref<2x16xf32, #tpu.memory_space<vmem>>, vector<2x16xf32>
    %c0_1 = arith.constant 0 : index
    %c0_2 = arith.constant 0 : index
    %1 = vector.load %arg3[%c0_1, %c0_2] : memref<2x128xf32, #tpu.memory_space<vmem>>, vector<2x128xf32>
    %c0_3 = arith.constant 0 : index
    %c0_4 = arith.constant 0 : index
    %2 = vector.load %arg4[%c0_3, %c0_4] : memref<16x256xf32, #tpu.memory_space<vmem>>, vector<16x256xf32>
    %cst = arith.constant dense<0.000000e+00> : vector<2x256xf32>
    %3 = tpu.matmul %0, %2, %cst {dimension_numbers = #tpu.dot_dimension_numbers<[1], [0], [0], [1], [0, 0, 1, 1], [], []>} : vector<2x16xf32>, vector<16x256xf32>, vector<2x256xf32> -> vector<2x256xf32>
    %c0_5 = arith.constant 0 : index
    %c0_6 = arith.constant 0 : index
    %4 = vector.load %arg5[%c0_5, %c0_6] : memref<128x256xf32, #tpu.memory_space<vmem>>, vector<128x256xf32>
    %cst_7 = arith.constant dense<0.000000e+00> : vector<2x256xf32>
    %5 = tpu.matmul %1, %4, %cst_7 {dimension_numbers = #tpu.dot_dimension_numbers<[1], [0], [0], [1], [0, 0, 1, 1], [], []>} : vector<2x128xf32>, vector<128x256xf32>, vector<2x256xf32> -> vector<2x256xf32>
    %6 = arith.addf %3, %5 : vector<2x256xf32>
    %c0_8 = arith.constant 0 : index
    %c0_9 = arith.constant 0 : index
    %7 = vector.load %arg6[%c0_8, %c0_9] : memref<1x256xf32, #tpu.memory_space<vmem>>, vector<1x256xf32>
    %8 = vector.broadcast %7 : vector<1x256xf32> to vector<2x256xf32>
    %9 = arith.addf %6, %8 : vector<2x256xf32>
    %10 = vector.extract_strided_slice %9 {offsets = [0, 0], sizes = [2, 128], strides = [1, 1]} : vector<2x256xf32> to vector<2x128xf32>
    %11 = arith.negf %10 : vector<2x128xf32>
    %12 = math.exp %11 : vector<2x128xf32>
    %cst_10 = arith.constant 1.000000e+00 : f32
    %13 = vector.broadcast %cst_10 : f32 to vector<2x128xf32>
    %14 = arith.addf %13, %12 : vector<2x128xf32>
    %15 = arith.divf %13, %14 : vector<2x128xf32>
    %16 = vector.extract_strided_slice %9 {offsets = [0, 128], sizes = [2, 128], strides = [1, 1]} : vector<2x256xf32> to vector<2x128xf32>
    %17 = math.tanh %16 : vector<2x128xf32>
    %18 = arith.subf %1, %17 : vector<2x128xf32>
    %19 = arith.mulf %15, %18 : vector<2x128xf32>
    %20 = arith.addf %17, %19 : vector<2x128xf32>
    %c0_11 = arith.constant 0 : index
    %c0_12 = arith.constant 0 : index
    %21 = vector.load %arg7[%c0_11, %c0_12] : memref<2x128xf32, #tpu.memory_space<vmem>>, vector<2x128xf32>
    tpu.vector_store %arg7[%c0_11, %c0_12], %20 {strides = array<i32>} : memref<2x128xf32, #tpu.memory_space<vmem>>, vector<2x128xf32>,
    return
  }
  func.func @transform_0(%arg0: i32, %arg1: i32) -> (i32, i32) {
    %c0_i32 = arith.constant 0 : i32
    %c0_i32_0 = arith.constant 0 : i32
    return %arg1, %c0_i32 : i32, i32
  }
  func.func @transform_1(%arg0: i32, %arg1: i32) -> (i32, i32) {
    %c0_i32 = arith.constant 0 : i32
    %c0_i32_0 = arith.constant 0 : i32
    return %arg1, %c0_i32 : i32, i32
  }
  func.func @transform_2(%arg0: i32, %arg1: i32) -> (i32, i32) {
    %c0_i32 = arith.constant 0 : i32
    %c0_i32_0 = arith.constant 0 : i32
    %c0_i32_1 = arith.constant 0 : i32
    return %c0_i32, %c0_i32_0 : i32, i32
  }
  func.func @transform_3(%arg0: i32, %arg1: i32) -> (i32, i32) {
    %c0_i32 = arith.constant 0 : i32
    %c0_i32_0 = arith.constant 0 : i32
    %c0_i32_1 = arith.constant 0 : i32
    return %c0_i32, %c0_i32_0 : i32, i32
  }
  func.func @transform_4(%arg0: i32, %arg1: i32) -> (i32, i32) {
    %c0_i32 = arith.constant 0 : i32
    %c0_i32_0 = arith.constant 0 : i32
    %c0_i32_1 = arith.constant 0 : i32
    return %c0_i32, %c0_i32_0 : i32, i32
  }
  func.func @transform_5(%arg0: i32, %arg1: i32) -> (i32, i32) {
    %c0_i32 = arith.constant 0 : i32
    return %arg1, %arg0 : i32, i32
  }
}

</mosaic_0001>

<bundles_post_ra>
// kernel: gru_cell_forward.1
= control target key start
LH: loop header
LB: loop body
LE: loop exit
PB: predicated region body
PF: predicated region fallthrough
CT: control target
= control target key end

     0   :  { %10 = vsyncpa [#allocation3], 0  ;;  %s479_s0 = inlined_call_operand.vmem [shape: f32[2,16], index: 0, kind: input, shape index: {}]   ;;  %s480_s1 = inlined_call_operand.vmem [shape: f32[2,128], index: 1, kind: input, shape index: {}]   ;;  %s481_s2 = inlined_call_operand.hbm [shape: f32[16,256], index: 2, kind: input, shape index: {}]   ;;  %s482_s3 = inlined_call_operand.hbm [shape: f32[128,256], index: 3, kind: input, shape index: {}]   ;;  %s483_s4 = inlined_call_operand.vmem [shape: f32[1,256], index: 4, kind: input, shape index: {}]   ;;  %s484_s5 = inlined_call_operand.hbm [shape: f32[2,128], index: 5, kind: output, shape index: {}]  }
   0x1   :  { %11 = vsyncpa [#allocation6], 0 }
   0x2   :  { %12 = vsyncpa [#allocation4], 0  ;;  %s398_s18 = smov [#allocation2]   ;;  %s326_s22 = scalar_lea.hbm %s481_s2, 512 }
   0x3   :  { %s22_s19 = sshll.u32 %s398_s18, 4  ;;  %p327_p0 = scmp.ne.s32.totalorder %s481_s2, %s326_s22  ;;  %s23_s19 = int_to_ptr.vmem [resolvable:$true] %s22_s19 }
   0x4   :  { %p330_p1 = scmp.lt.u32.totalorder %s326_s22, %s481_s2 }
   0x6   :  { %p332_p2 = pnand %p330_p1, %p327_p0 }
   0x8   :  { %335 = shalt.err (!%p332_p2)
}
   0x9   :  { %s336_s27 = scalar_lea.vmem %s23_s19, 512  ;;  %p341_p4 = scmp.lt.s32.totalorder %s23_s19, %s23_s19 }
   0xa   :  { %p337_p3 = scmp.ne.s32.totalorder %s23_s19, %s336_s27  ;;  %p342_p5 = scmp.lt.s32.totalorder %s336_s27, %s336_s27 }
   0xc   :  { %p343_p6 = por %p342_p5, %p341_p4 }
   0xe   :  { %p344_p7 = pnand %p343_p6, %p337_p3 }
  0x10   :  { %347 = shalt.err (!%p344_p7)
}
  0x11   :  { %s399_s28 = smov 256   ;;  %s400_s29 = smov 16  }
  0x12   :  { %28 = dma.hbm_to_vmem [thread:$0]  %s481_s2, 512, %s23_s19, [#allocation3], %s399_s28, %s399_s28, %s400_s29  }
  0x13   :  { %s401_s7 = smov [#allocation5]   ;;  %s348_s11 = scalar_lea.hbm %s482_s3, 4096 }
  0x14   :  { %s34_s8 = sshll.u32 %s401_s7, 4  ;;  %p349_p8 = scmp.ne.s32.totalorder %s482_s3, %s348_s11  ;;  %s35_s8 = int_to_ptr.vmem [resolvable:$true] %s34_s8 }
  0x15   :  { %p352_p9 = scmp.lt.u32.totalorder %s348_s11, %s482_s3 }
  0x17   :  { %p354_p10 = pnand %p352_p9, %p349_p8 }
  0x19   :  { %357 = shalt.err (!%p354_p10)
}
  0x1a   :  { %s358_s16 = scalar_lea.vmem %s35_s8, 4096  ;;  %p363_p12 = scmp.lt.s32.totalorder %s35_s8, %s35_s8 }
  0x1b   :  { %p359_p11 = scmp.ne.s32.totalorder %s35_s8, %s358_s16  ;;  %p364_p13 = scmp.lt.s32.totalorder %s358_s16, %s358_s16 }
  0x1d   :  { %p365_p0 = por %p364_p13, %p363_p12 }
  0x1f   :  { %p366_p1 = pnand %p365_p0, %p359_p11 }
  0x21   :  { %369 = shalt.err (!%p366_p1)
}
  0x22   :  { %40 = dma.hbm_to_vmem [thread:$0]  %s482_s3, 4096, %s35_s8, [#allocation6], %s399_s28, %s399_s28, %s400_s29  }
  0x23   :  { %392 = dma.done.wait [#allocation3], 512  }
  0x24   :  { %393 = vsyncadd [#allocation3], 4294966784 }
  0x25   :  { %394 = dma.done.wait [#allocation6], 4096  }
  0x26   :  { %395 = vsyncadd [#allocation6], 4294963200  ;;  %v402_v0 = vmov 0.0   ;;  %v56_v1 = vld [vmem:[#allocation5 + $0x8] sm:$0xff]  ;;  %v58_v2 = vld [vmem:[#allocation5 + $0x18] sm:$0xff]  ;;  %vm158_vm0 = vcmask 130048   ;;  %v235_v59 = vlaneseq }
  0x27   :  { %226 = vmatprep.mubr.f32.mxu0 %v402_v0  ;;  %151 = vmatprep.mubr.f32.mxu1 %v402_v0  ;;  %v55_v3 = vld [vmem:[#allocation5] sm:$0xff]  ;;  %v276_v4 = vpack.c.bf16 %v58_v2, %v56_v1  ;;  %v57_v5 = vld [vmem:[#allocation5 + $0x10] sm:$0xff]  ;;  %v60_v6 = vld [vmem:[#allocation5 + $0x28] sm:$0xff] }
  0x28   :  { %v62_v7 = vld [vmem:[#allocation5 + $0x38] sm:$0xff]  ;;  %v278_v8 = vpack.c.bf16 %v57_v5, %v55_v3  ;;  %v59_v10 = vld [vmem:[#allocation5 + $0x20] sm:$0xff]  ;;  %v61_v11 = vld [vmem:[#allocation5 + $0x30] sm:$0xff]  ;;  %v236_v60 = vshrl.u32 %v235_v59, 7 }
  0x29   :  { %v280_v9 = vpack.c.bf16 %v62_v7, %v60_v6  ;;  %v64_v12 = vld [vmem:[#allocation5 + $0x48] sm:$0xff]  ;;  %277 = vmatprep.subr.bf16.mxu1 %v276_v4  ;;  %v66_v13 = vld [vmem:[#allocation5 + $0x58] sm:$0xff]  ;;  %v282_v14 = vpack.c.bf16 %v61_v11, %v59_v10  ;;  %v63_v16 = vld [vmem:[#allocation5 + $0x40] sm:$0xff] }
  0x2a   :  { %279 = vmatpush1.bf16.msra.mxu1 %v278_v8  ;;  %v284_v15 = vpack.c.bf16 %v66_v13, %v64_v12  ;;  %v65_v17 = vld [vmem:[#allocation5 + $0x50] sm:$0xff]  ;;  %v68_v18 = vld [vmem:[#allocation5 + $0x68] sm:$0xff]  ;;  %v70_v19 = vld [vmem:[#allocation5 + $0x78] sm:$0xff]  ;;  %v237_v61 = vsub.s32 0, %v236_v60  ;;  %v241_v5 = vsub.s32 1, %v236_v60 }
  0x2b   :  { %281 = vmatprep.subr.bf16.mxu1 %v280_v9  ;;  %v286_v20 = vpack.c.bf16 %v65_v17, %v63_v16  ;;  %v67_v21 = vld [vmem:[#allocation5 + $0x60] sm:$0xff]  ;;  %v288_v22 = vpack.c.bf16 %v70_v19, %v68_v18  ;;  %v69_v23 = vld [vmem:[#allocation5 + $0x70] sm:$0xff]  ;;  %v52_v24 = vld [vmem:[#allocation2 + $0x8] sm:$0xff] }
  0x2c   :  { %v54_v25 = vld [vmem:[#allocation2 + $0x18] sm:$0xff]  ;;  %v72_v26 = vld [vmem:[#allocation5 + $0x88] sm:$0xff]  ;;  %v51_v29 = vld [vmem:[#allocation2] sm:$0xff]  ;;  %v290_v31 = vpack.c.bf16 %v69_v23, %v67_v21 }
  0x2d   :  { %v74_v27 = vld [vmem:[#allocation5 + $0x98] sm:$0xff]  ;;  %v308_v28 = vpack.c.bf16 %v54_v25, %v52_v24  ;;  %v53_v30 = vld [vmem:[#allocation2 + $0x10] sm:$0xff]  ;;  %v71_v34 = vld [vmem:[#allocation5 + $0x80] sm:$0xff] }
  0x2e   :  { %283 = vmatpush1.bf16.msra.mxu1 %v282_v14  ;;  %v310_v32 = vpack.c.bf16 %v53_v30, %v51_v29  ;;  %v292_v33 = vpack.c.bf16 %v74_v27, %v72_v26  ;;  %v73_v35 = vld [vmem:[#allocation5 + $0x90] sm:$0xff]  ;;  %v76_v36 = vld [vmem:[#allocation5 + $0xa8] sm:$0xff]  ;;  %v78_v37 = vld [vmem:[#allocation5 + $0xb8] sm:$0xff] }
  0x2f   :  { %285 = vmatprep.subr.bf16.mxu1 %v284_v15  ;;  %309 = vmatprep.subr.bf16.mxu0 %v308_v28  ;;  %v49_v38 = vld [vmem:[%s479_s0] sm:$0x3]  ;;  %v294_v39 = vpack.c.bf16 %v73_v35, %v71_v34  ;;  %v296_v40 = vpack.c.bf16 %v78_v37, %v76_v36  ;;  %v77_v42 = vld [vmem:[#allocation5 + $0xb0] sm:$0xff]  ;;  %v80_v43 = vld [vmem:[#allocation5 + $0xc8] sm:$0xff] }
  0x30   :  { %311 = vmatpush1.bf16.msra.mxu0 %v310_v32  ;;  %v75_v41 = vld [vmem:[#allocation5 + $0xa0] sm:$0xff]  ;;  %v82_v44 = vld [vmem:[#allocation5 + $0xd8] sm:$0xff]  ;;  %v81_v48 = vld [vmem:[#allocation5 + $0xd0] sm:$0xff] }
  0x31   :  { %v298_v45 = vpack.c.bf16 %v77_v42, %v75_v41  ;;  %v300_v46 = vpack.c.bf16 %v82_v44, %v80_v43  ;;  %v79_v47 = vld [vmem:[#allocation5 + $0xc0] sm:$0xff]  ;;  %v84_v49 = vld [vmem:[#allocation5 + $0xe8] sm:$0xff]  ;;  %v86_v50 = vld [vmem:[#allocation5 + $0xf8] sm:$0xff] }
  0x32   :  { %287 = vmatpush1.bf16.msra.mxu1 %v286_v20  ;;  %v302_v51 = vpack.c.bf16 %v81_v48, %v79_v47  ;;  %v304_v52 = vpack.c.bf16 %v86_v50, %v84_v49  ;;  %v83_v53 = vld [vmem:[#allocation5 + $0xe0] sm:$0xff]  ;;  %v85_v54 = vld [vmem:[#allocation5 + $0xf0] sm:$0xff] }
  0x33   :  { %289 = vmatprep.subr.bf16.mxu1 %v288_v22  ;;  %274 = vmatmul.mubr.msk.f32.vlgmr.msra.gmra.mrb[0].mxu0 %vm158_vm0, %v49_v38  ;;  %v306_v55 = vpack.c.bf16 %v85_v54, %v83_v53  ;;  %v50_v56 = vld [vmem:[%s480_s1] sm:$0x3]  ;;  %s403_s1 = smov [#allocation7]  }
  0x34   :  { %v233_v62 = vld [vmem:[%s483_s4] sm:$0x3]  ;;  %s264_s4 = sshll.u32 %s403_s1, 4  ;;  %s265_s4 = int_to_ptr.vmem [resolvable:$true] %s264_s4 }
  0x35   :  { %v238_v63 = vrot.slane %v233_v62, %v237_v61  ;;  %v242_v7 = vrot.slane %v233_v62, %v241_v5  ;;  %s370_s22 = scalar_lea.vmem %s265_s4, 32  ;;  %p375_p3 = scmp.lt.s32.totalorder %s265_s4, %s265_s4 }
  0x36   :  { %291 = vmatpush1.bf16.msra.mxu1 %v290_v31  ;;  %p371_p2 = scmp.ne.s32.totalorder %s265_s4, %s370_s22  ;;  %p376_p4 = scmp.lt.s32.totalorder %s370_s22, %s370_s22 }
  0x37   :  { %293 = vmatprep.subr.bf16.mxu1 %v292_v33 }
  0x38   :  { %p377_p5 = por %p376_p4, %p375_p3 }
  0x3a   :  { %295 = vmatpush1.bf16.msra.mxu1 %v294_v39  ;;  %p378_p6 = pnand %p377_p5, %p371_p2 }
  0x3b   :  { %297 = vmatprep.subr.bf16.mxu1 %v296_v40 }
  0x3e   :  { %299 = vmatpush1.bf16.msra.mxu1 %v298_v45 }
  0x3f   :  { %301 = vmatprep.subr.bf16.mxu1 %v300_v46 }
  0x42   :  { %303 = vmatpush1.bf16.msra.mxu1 %v302_v51 }
  0x43   :  { %305 = vmatprep.subr.bf16.mxu1 %v304_v52 }
  0x46   :  { %307 = vmatpush1.bf16.msra.mxu1 %v306_v55 }
  0x49   :  { %152 = vmatmul.mubr.f32.vlgmr.msra.gmra.mrb[0].mxu1 %v50_v56 }
 0x106   :  { %v228_v57 = vpop.f32.mrb[0].mxu0 }
 0x107   :  { %v230_v58 = vpop.f32.mrb[1].mxu0 }
 0x11c   :  { %v153_v0 = vpop.f32.mrb[0].mxu1 }
 0x11d   :  { %v229_v1 = vadd.f32 %v228_v57, %v153_v0  ;;  %v155_v2 = vpop.f32.mrb[1].mxu1 }
 0x11e   :  { %v231_v3 = vadd.f32 %v230_v58, %v155_v2 }
 0x11f   :  { %v245_v4 = vadd.f32 %v238_v63, %v229_v1 }
 0x120   :  { %v246_v8 = vadd.f32 %v242_v7, %v231_v3 }
 0x121   :  { %v275_v6 = vmul.f32 -1.442695, %v245_v4 }
 0x123   :  { %320 = vpow2.f32 %v275_v6 }
 0x124   :  { %322 = vtanh.f32 %v246_v8 }
 0x12d   :  { %v321_v9 = vpop.eup %320 }
 0x12e   :  { %v250_v10 = vadd.f32 1.0, %v321_v9  ;;  %v323_v11 = vpop.eup %322 }
 0x12f   :  { %v254_v12 = vsub.f32 %v50_v56, %v323_v11 }
 0x130   :  { %324 = vrcp.f32 %v250_v10 }
 0x13a   :  { %v325_v13 = vpop.eup %324 }
 0x13b   :  { %v255_v14 = vmul.f32 %v325_v13, %v254_v12 }
 0x13d   :  { %v256_v15 = vadd.f32 %v323_v11, %v255_v14 }
 0x13f   :  { %257 = vst [vmem:[#allocation7] sm:$0x3] %v256_v15 }
 0x140   :  { %381 = shalt.err (!%p378_p6)
}
 0x141   :  { %s382_s25 = scalar_lea.hbm %s484_s5, 32 }
 0x142   :  { %p383_p7 = scmp.ne.s32.totalorder %s484_s5, %s382_s25  ;;  %p386_p8 = scmp.lt.u32.totalorder %s382_s25, %s484_s5 }
 0x144   :  { %p388_p9 = pnand %p386_p8, %p383_p7 }
 0x146   :  { %391 = shalt.err (!%p388_p9)
}
 0x147   :  { %267 = dma.vmem_to_hbm [thread:$0]  %s265_s4, 32, %s484_s5, [#allocation4]  }
 0x148   :  { %396 = dma.done.wait [#allocation4], 32  }
 0x149   :  { %397 = vsyncadd [#allocation4], 4294967264 }
 0x14a   :  { %271 = vsyncpa [#allocation3], 1 }
 0x14b   :  { %272 = vsyncpa [#allocation6], 1 }
 0x14c   :  { %273 = vsyncpa [#allocation4], 1 }

</bundles_post_ra>
